<compile_context>
chip_gen: v7x
topology: tpu7x:2x2x1
jax: 0.10.0
libtpu: 0.0.40
codegen_flags: <defaults>
</compile_context>

<pallas_src>
import jax
import jax.numpy as jnp
from jax import lax
from jax.experimental import pallas as pl
from jax.experimental.pallas import tpu as pltpu

EPS = 1e-5  # MinkowskiBatchNorm default


def _fma_bias_relu_kernel(x_ref, w_ref, b_ref, o_ref):
    """All operands are pre-broadcast, lane-dense tiles -> pure vld + VPU FMA.

    x_ref : [T, Cout, TM] f32  pre-shifted taps, replicated across Cout sublanes
    w_ref : [T, Cout, TM] f32  BN-folded weights, pre-broadcast across TM lanes
    b_ref : [Cout, TM]    f32  BN-folded bias,   pre-broadcast across TM lanes
    o_ref : [Cout, TM]    f32  lane-dense output tile
    """
    T = w_ref.shape[0]
    UNROLL = 4
    nfull = T // UNROLL

    def body(j, acc):
        base = j * UNROLL
        for u in range(UNROLL):                      # bounded unroll for ILP
            acc = acc + w_ref[base + u] * x_ref[base + u]   # [Cout, TM] FMA
        return acc

    acc = lax.fori_loop(0, nfull, body, b_ref[...])  # init = folded bias tile
    for t in range(nfull * UNROLL, T):               # static remainder (0 here)
        acc = acc + w_ref[t] * x_ref[t]
    o_ref[...] = jnp.maximum(acc, 0.0)               # ReLU


def conv_norm_act(x_nchw, w, bias, gamma, beta, run_mean, run_var):
    """x_nchw: [N, Cin, H, W] f32 (PyTorch layout); w: [k*k, Cin, Cout] (Minkowski)."""
    N, Cin, H, W = x_nchw.shape
    KK, _, Cout = w.shape
    k = int(round(KK ** 0.5))
    pad = (k - 1) // 2
    Hp, Wp = H + 2 * pad, W + 2 * pad
    T = KK * Cin

    # ---- fold inference BatchNorm into conv weight & bias (one-time wrapper math)
    scale = gamma * lax.rsqrt(run_var + EPS)                        # [Cout]
    w_f = (w * scale[None, None, :]).astype(jnp.float32)            # [KK, Cin, Cout]
    b_f = ((bias - run_mean) * scale + beta).astype(jnp.float32)    # [Cout]
    w_flat = w_f.reshape(T, Cout)                                   # row t = tap*Cin + ci

    # ---- per-image flat output length (multiple of 128 -> unmasked full-lane stores)
    tm_img = ((H * Wp + 127) // 128) * 128
    max_ofs = (k - 1) * Wp + (k - 1)
    lin = tm_img + max_ofs            # invariant: every tap read (ofs + p) < lin

    # ---- images per step: batch work per grid step, keep >= 2 parallel steps (v7x)
    target_lanes = 2048
    nb = max(1, target_lanes // tm_img)
    if N >= 2:
        nb = min(nb, N // 2)          # >= 2 grid steps so both v7x TCs get work
    nb = max(1, nb)
    while N % nb:
        nb -= 1
    TM = nb * tm_img                  # lane tile per grid step
    L = N * tm_img                    # total lane extent (batch folded into lanes)
    steps = L // TM

    # ---- zero-pad, flatten, pre-shift the k*k taps in the wrapper (partial im2col);
    #      input stays f32 (kernel is overhead-bound, not bandwidth-bound)
    xp = jnp.pad(x_nchw, ((0, 0), (0, 0), (pad, pad), (pad, pad)))
    xf = xp.reshape(N, Cin, Hp * Wp).astype(jnp.float32)
    xf = jnp.pad(xf, ((0, 0), (0, 0), (0, lin - Hp * Wp)))
    offsets = tuple(dy * Wp + dx for dy in range(k) for dx in range(k))
    rows = [xf[:, ci, ofs:ofs + tm_img] for ofs in offsets for ci in range(Cin)]
    x_shift = jnp.stack(rows, axis=1)                               # [N, T, tm_img]
    x_flat = jnp.transpose(x_shift, (1, 0, 2)).reshape(T, L)        # [T, L]
    # replicate across Cout sublanes in the wrapper -> no sublane broadcast in kernel
    x_b = jnp.broadcast_to(x_flat[:, None, :], (T, Cout, L))
    # pre-broadcast weights / bias across lanes -> no XLU lane broadcast in kernel
    w_b = jnp.broadcast_to(w_flat[:, :, None], (T, Cout, TM))
    b_b = jnp.broadcast_to(b_f[:, None], (Cout, TM))

    cost = pl.CostEstimate(
        flops=2 * T * Cout * L,
        transcendentals=0,
        bytes_accessed=(x_b.size + w_b.size + b_b.size + Cout * L) * 4)

    out = pl.pallas_call(
        _fma_bias_relu_kernel,
        out_shape=jax.ShapeDtypeStruct((Cout, L), jnp.float32),
        grid=(steps,),
        in_specs=[
            pl.BlockSpec((T, Cout, TM), lambda i: (0, 0, i)),   # shifted-tap tile
            pl.BlockSpec((T, Cout, TM), lambda i: (0, 0, 0)),   # resident weights
            pl.BlockSpec((Cout, TM), lambda i: (0, 0)),         # resident bias
        ],
        out_specs=pl.BlockSpec((Cout, TM), lambda i: (0, i)),
        compiler_params=pltpu.CompilerParams(
            dimension_semantics=("parallel",)),
        cost_estimate=cost,
    )(x_b, w_b, b_b)

    # crop: drop lane padding + wrap-around columns, return NCHW
    y = out.reshape(Cout, N, tm_img)[:, :, :H * Wp]
    y = y.reshape(Cout, N, H, Wp)[:, :, :, :W]
    return jnp.transpose(y, (1, 0, 2, 3))


def _reference(x_nchw, w, bias, gamma, beta, run_mean, run_var):
    KK, Cin, Cout = w.shape
    k = int(round(KK ** 0.5))
    w_oihw = jnp.transpose(w.reshape(k, k, Cin, Cout), (3, 2, 0, 1))
    y = lax.conv_general_dilated(
        x_nchw, w_oihw, window_strides=(1, 1), padding="SAME",
        dimension_numbers=("NCHW", "OIHW", "NCHW"),
        precision=lax.Precision.HIGHEST)
    cs = (1, Cout, 1, 1)
    y = y + bias.reshape(cs)
    y = (y - run_mean.reshape(cs)) * lax.rsqrt(run_var.reshape(cs) + EPS) \
        * gamma.reshape(cs) + beta.reshape(cs)
    return jnp.maximum(y, 0.0)


if __name__ == "__main__":
    # ConvNormActivation(input_channels=4, out_channels=8, kernel_size=3, stride=1,
    #                    norm_layer=MinkowskiBatchNorm, activation_layer=MinkowskiReLU,
    #                    bias=True, D=2)
    N, H, W, Cin, Cout, K = 2, 16, 16, 4, 8, 3

    key = jax.random.PRNGKey(0)
    kx, kw, kb, kg, kbeta, km, kv = jax.random.split(key, 7)

    x_nchw = jax.random.normal(kx, (N, Cin, H, W), dtype=jnp.float32)   # PyTorch layout
    # Minkowski conv weight layout: [kernel_volume, Cin, Cout]
    w = jax.random.normal(kw, (K * K, Cin, Cout), dtype=jnp.float32) * 0.1
    bias = jax.random.normal(kb, (Cout,), dtype=jnp.float32) * 0.1
    gamma = 1.0 + 0.1 * jax.random.normal(kg, (Cout,), dtype=jnp.float32)
    beta = 0.1 * jax.random.normal(kbeta, (Cout,), dtype=jnp.float32)
    run_mean = 0.1 * jax.random.normal(km, (Cout,), dtype=jnp.float32)
    run_var = 1.0 + 0.1 * jax.nn.softplus(jax.random.normal(kv, (Cout,), dtype=jnp.float32))

    y = conv_norm_act(x_nchw, w, bias, gamma, beta, run_mean, run_var)
    y = jax.block_until_ready(y)

    y_ref = _reference(x_nchw, w, bias, gamma, beta, run_mean, run_var)
    assert y.shape == (N, Cout, H, W)
    # full-f32 path -> tight tolerance (per review guidance)
    assert jnp.allclose(y, y_ref, atol=2e-5, rtol=2e-5), "mismatch vs JAX reference"

    print("KERNEL_OK")
</pallas_src>

<mosaic_0001>
module attributes {stable_mosaic.version = 11 : i64} {
  func.func @_fma_bias_relu_kernel(%arg0: i32, %arg1: memref<36x8x384xf32, #tpu.memory_space<vmem>>, %arg2: memref<36x8x384xf32, #tpu.memory_space<vmem>>, %arg3: memref<8x384xf32, #tpu.memory_space<vmem>>, %arg4: memref<8x384xf32, #tpu.memory_space<vmem>>) attributes {dimension_semantics = [#tpu.dimension_semantics<parallel>], iteration_bounds = array<i64: 2>, scalar_prefetch = 0 : i64, scratch_operands = 0 : i64, tpu.core_type = #tpu.core_type<tc>, window_params = [{transform_indices = @transform_0, window_bounds = array<i64: 36, 8, 384>}, {pipeline_mode = #tpu.pipeline_mode<synchronous>, transform_indices = @transform_1, window_bounds = array<i64: 36, 8, 384>}, {pipeline_mode = #tpu.pipeline_mode<synchronous>, transform_indices = @transform_2, window_bounds = array<i64: 8, 384>}, {transform_indices = @transform_3, window_bounds = array<i64: 8, 384>}]} {
    %c0 = arith.constant 0 : index
    %c0_0 = arith.constant 0 : index
    %0 = vector.load %arg3[%c0, %c0_0] : memref<8x384xf32, #tpu.memory_space<vmem>>, vector<8x384xf32>
    %c0_i32 = arith.constant 0 : i32
    %c9_i32 = arith.constant 9 : i32
    %1 = arith.addi %c0_i32, %c9_i32 : i32
    %c1_i32 = arith.constant 1 : i32
    %2 = scf.for %arg5 = %c0_i32 to %1 step %c1_i32 iter_args(%arg6 = %0) -> (vector<8x384xf32>)  : i32 {
      %c4_i32 = arith.constant 4 : i32
      %6 = arith.muli %arg5, %c4_i32 : i32
      %c0_i32_4 = arith.constant 0 : i32
      %7 = arith.addi %6, %c0_i32_4 : i32
      %8 = arith.index_cast %7 : i32 to index
      %c0_5 = arith.constant 0 : index
      %c0_6 = arith.constant 0 : index
      %9 = vector.load %arg2[%8, %c0_5, %c0_6] : memref<36x8x384xf32, #tpu.memory_space<vmem>>, vector<1x8x384xf32>
      %10 = vector.shape_cast %9 : vector<1x8x384xf32> to vector<8x384xf32>
      %c0_i32_7 = arith.constant 0 : i32
      %11 = arith.addi %6, %c0_i32_7 : i32
      %12 = arith.index_cast %11 : i32 to index
      %c0_8 = arith.constant 0 : index
      %c0_9 = arith.constant 0 : index
      %13 = vector.load %arg1[%12, %c0_8, %c0_9] : memref<36x8x384xf32, #tpu.memory_space<vmem>>, vector<1x8x384xf32>
      %14 = vector.shape_cast %13 : vector<1x8x384xf32> to vector<8x384xf32>
      %15 = arith.mulf %10, %14 : vector<8x384xf32>
      %16 = arith.addf %arg6, %15 : vector<8x384xf32>
      %c1_i32_10 = arith.constant 1 : i32
      %17 = arith.addi %6, %c1_i32_10 : i32
      %18 = arith.index_cast %17 : i32 to index
      %c0_11 = arith.constant 0 : index
      %c0_12 = arith.constant 0 : index
      %19 = vector.load %arg2[%18, %c0_11, %c0_12] : memref<36x8x384xf32, #tpu.memory_space<vmem>>, vector<1x8x384xf32>
      %20 = vector.shape_cast %19 : vector<1x8x384xf32> to vector<8x384xf32>
      %c1_i32_13 = arith.constant 1 : i32
      %21 = arith.addi %6, %c1_i32_13 : i32
      %22 = arith.index_cast %21 : i32 to index
      %c0_14 = arith.constant 0 : index
      %c0_15 = arith.constant 0 : index
      %23 = vector.load %arg1[%22, %c0_14, %c0_15] : memref<36x8x384xf32, #tpu.memory_space<vmem>>, vector<1x8x384xf32>
      %24 = vector.shape_cast %23 : vector<1x8x384xf32> to vector<8x384xf32>
      %25 = arith.mulf %20, %24 : vector<8x384xf32>
      %26 = arith.addf %16, %25 : vector<8x384xf32>
      %c2_i32 = arith.constant 2 : i32
      %27 = arith.addi %6, %c2_i32 : i32
      %28 = arith.index_cast %27 : i32 to index
      %c0_16 = arith.constant 0 : index
      %c0_17 = arith.constant 0 : index
      %29 = vector.load %arg2[%28, %c0_16, %c0_17] : memref<36x8x384xf32, #tpu.memory_space<vmem>>, vector<1x8x384xf32>
      %30 = vector.shape_cast %29 : vector<1x8x384xf32> to vector<8x384xf32>
      %c2_i32_18 = arith.constant 2 : i32
      %31 = arith.addi %6, %c2_i32_18 : i32
      %32 = arith.index_cast %31 : i32 to index
      %c0_19 = arith.constant 0 : index
      %c0_20 = arith.constant 0 : index
      %33 = vector.load %arg1[%32, %c0_19, %c0_20] : memref<36x8x384xf32, #tpu.memory_space<vmem>>, vector<1x8x384xf32>
      %34 = vector.shape_cast %33 : vector<1x8x384xf32> to vector<8x384xf32>
      %35 = arith.mulf %30, %34 : vector<8x384xf32>
      %36 = arith.addf %26, %35 : vector<8x384xf32>
      %c3_i32 = arith.constant 3 : i32
      %37 = arith.addi %6, %c3_i32 : i32
      %38 = arith.index_cast %37 : i32 to index
      %c0_21 = arith.constant 0 : index
      %c0_22 = arith.constant 0 : index
      %39 = vector.load %arg2[%38, %c0_21, %c0_22] : memref<36x8x384xf32, #tpu.memory_space<vmem>>, vector<1x8x384xf32>
      %40 = vector.shape_cast %39 : vector<1x8x384xf32> to vector<8x384xf32>
      %c3_i32_23 = arith.constant 3 : i32
      %41 = arith.addi %6, %c3_i32_23 : i32
      %42 = arith.index_cast %41 : i32 to index
      %c0_24 = arith.constant 0 : index
      %c0_25 = arith.constant 0 : index
      %43 = vector.load %arg1[%42, %c0_24, %c0_25] : memref<36x8x384xf32, #tpu.memory_space<vmem>>, vector<1x8x384xf32>
      %44 = vector.shape_cast %43 : vector<1x8x384xf32> to vector<8x384xf32>
      %45 = arith.mulf %40, %44 : vector<8x384xf32>
      %46 = arith.addf %36, %45 : vector<8x384xf32>
      scf.yield %46 : vector<8x384xf32>
    }
    %c9_i32_1 = arith.constant 9 : i32
    %cst = arith.constant 0.000000e+00 : f32
    %3 = vector.broadcast %cst : f32 to vector<8x384xf32>
    %4 = arith.maximumf %2, %3 : vector<8x384xf32>
    %c0_2 = arith.constant 0 : index
    %c0_3 = arith.constant 0 : index
    %5 = vector.load %arg4[%c0_2, %c0_3] : memref<8x384xf32, #tpu.memory_space<vmem>>, vector<8x384xf32>
    tpu.vector_store %arg4[%c0_2, %c0_3], %4 {strides = array<i32>} : memref<8x384xf32, #tpu.memory_space<vmem>>, vector<8x384xf32>,
    return
  }
  func.func @transform_0(%arg0: i32) -> (i32, i32, i32) {
    %c0_i32 = arith.constant 0 : i32
    %c0_i32_0 = arith.constant 0 : i32
    %c0_i32_1 = arith.constant 0 : i32
    return %c0_i32, %c0_i32_0, %arg0 : i32, i32, i32
  }
  func.func @transform_1(%arg0: i32) -> (i32, i32, i32) {
    %c0_i32 = arith.constant 0 : i32
    %c0_i32_0 = arith.constant 0 : i32
    %c0_i32_1 = arith.constant 0 : i32
    %c0_i32_2 = arith.constant 0 : i32
    return %c0_i32, %c0_i32_0, %c0_i32_1 : i32, i32, i32
  }
  func.func @transform_2(%arg0: i32) -> (i32, i32) {
    %c0_i32 = arith.constant 0 : i32
    %c0_i32_0 = arith.constant 0 : i32
    %c0_i32_1 = arith.constant 0 : i32
    return %c0_i32, %c0_i32_0 : i32, i32
  }
  func.func @transform_3(%arg0: i32) -> (i32, i32) {
    %c0_i32 = arith.constant 0 : i32
    %c0_i32_0 = arith.constant 0 : i32
    return %c0_i32, %arg0 : i32, i32
  }
}

</mosaic_0001>

<bundles_post_ra>
// kernel: tpu_custom_call.1
= control target key start
LH: loop header
LB: loop body
LE: loop exit
PB: predicated region body
PF: predicated region fallthrough
CT: control target
= control target key end

     0   :  { %8 = vsyncpa [#allocation3], 0  ;;  %s1111_s0 = inlined_call_operand.hbm [shape: f32[36,8,768], index: 0, kind: input, shape index: {}]   ;;  %s1112_s1 = inlined_call_operand.hbm [shape: f32[36,8,384], index: 1, kind: input, shape index: {}]   ;;  %s1113_s2 = inlined_call_operand.hbm [shape: f32[8,384], index: 2, kind: input, shape index: {}]   ;;  %s1114_s3 = inlined_call_operand.hbm [shape: f32[8,768], index: 3, kind: output, shape index: {}]  }
   0x1   :  { %10 = vsyncpa [#allocation3 + $0x1], 0 }
   0x2   :  { %11 = vsyncpa [#allocation6], 0 }
   0x3   :  { %12 = vsyncpa [#allocation4], 0 }
   0x4   :  { %14 = vsyncpa [#allocation4 + $0x1], 0  ;;  %s826_s12 = smov 0   ;;  %s828_s13 = smov 0  }
   0x5   :  { %s830_s14 = smov 0   ;;  %s832_s15 = smov 0  }
   0x6 LB: > { %s847_s16 = sadd.s32 4294967295, %s781_s15   ;;  %s454_s17 = sadd.s32 4294967294, %s781_s15   ;;  %s781_s15 = sphi %s832_s15, %s1143_s15   ;;  %s777_s14 = sphi %s830_s14, %s1142_s14   ;;  %s773_s13 = sphi %s828_s13, %s1141_s13   ;;  %s769_s12 = sphi %s826_s12, %s1140_s12  }
   0x7   : > { %s851_s18 = sadd.s32 1, %s781_s15   ;;  %s27_s19 = sadd.s32 1, %s777_s14 }
   0x8   : > { %s24_s20 = ssub.s32 %s781_s15, %s851_s18  ;;  %p34_p0 = scmp.ne.s32.totalorder %s777_s14, %s773_s13 }
   0x9   : > { %p25_p1 = scmp.eq.s32.totalorder %s24_s20, 0  ;;  %p35_p2 = scmp.eq.s32.totalorder %s781_s15, 0 }
   0xa   : > { %p40_p3 = scmp.ne.s32.totalorder %s773_s13, %s769_s12  ;;  %p1115_p4 = scmp.eq.s32.totalorder %s847_s16, 0 }
   0xb   : > { %s863_s21 = scalar_select %p25_p1, %s777_s14, %s27_s19  }
   0xc   : > { %p865_p5 = por %p35_p2, %p34_p0  ;;  %p871_p6 = por %p1115_p4, %p40_p3 }
   0xd   : > { %p106_p7 = scmp.eq.s32.totalorder %s847_s16, 1  ;;  %p112_p8 = scmp.eq.s32.totalorder %s454_s17, 1 }
   0xe   : > { %s1120_s22 = scalar_select %p865_p5, 1, 0 }
   0xf   : > { %s1121_s23 = scalar_select %p871_p6, 1, 0 }
  0x10   : > { %p455_p9 = scmp.ge.s32.totalorder %s781_s15, 1  ;;  %p119_p10 = scmp.lt.s32.totalorder %s781_s15, 3 }
  0x11   : > { %p878_p11 = por %p106_p7, %p34_p0  ;;  %p882_p12 = por %p112_p8, %p40_p3 }
  0x12   : > { %p886_p13 = pnand %p455_p9, %p119_p10  ;;  %s799_s27 = smov [#allocation5]  }
  0x13   : > { %s1122_s24 = scalar_select %p878_p11, 1, 0 }
  0x14   : > { %s1123_s25 = scalar_select %p882_p12, 1, 0 }
  0x15   : > { %s1124_s26 = scalar_select %p886_p13, 1, 0 }
  0x16   : > { %p519_p1 = pneg %p886_p13  ;;  %s131_s28 = sshll.u32 %s799_s27, 4  ;;  %s132_s28 = int_to_ptr.vmem [resolvable:$true] %s131_s28 }
  0x17   : > { %s800_s30 = smov [#allocation7]   ;;  %s609_s7 = scalar_lea.hbm %s1112_s1, 13824 }
  0x18   : > { %p894_p2 = pnand %p519_p1, %p1115_p4  ;;  %s145_s4 = sshll.u32 %s800_s30, 4  ;;  %s146_s4 = int_to_ptr.vmem [resolvable:$true] %s145_s4 }
  0x19   : > { %p610_p7 = scmp.ne.s32.totalorder %s1112_s1, %s609_s7  ;;  %p616_p1 = scmp.lt.u32.totalorder %s609_s7, %s1112_s1 }
  0x1a   : > { %p611_p8 = pneg %p894_p2 }
  0x1c   : > { %p612_p9 = pnand %p611_p8, %p610_p7 }
  0x1e   : > { %p613_p10 = pneg %p612_p9 }
  0x20   : > { %p618_p0 = pnand %p616_p1, %p613_p10 }
  0x22   : > { %621 = shalt.err (!%p618_p0)
}
  0x23   : > { %s622_s17 = scalar_lea.vmem %s132_s28, 13824  ;;  %p630_p11 = scmp.lt.s32.totalorder %s132_s28, %s132_s28 }
  0x24   : > { %p623_p4 = scmp.ne.s32.totalorder %s132_s28, %s622_s17  ;;  %p631_p6 = scmp.lt.s32.totalorder %s622_s17, %s622_s17 }
  0x26   : > { %p625_p3 = pnand %p623_p4, %p611_p8  ;;  %p632_p13 = por %p631_p6, %p630_p11 }
  0x28   : > { %p626_p12 = pneg %p625_p3 }
  0x2a   : > { %p633_p5 = pnand %p632_p13, %p626_p12 }
  0x2c   : > { %636 = shalt.err (!%p633_p5)
}
  0x2d   : > { %s801_s19 = smov 384   ;;  %s802_s20 = smov 24  }
  0x2e   : > { %522 = dma.hbm_to_vmem [thread:$0]  (!%p894_p2), %s1112_s1, 13824, %s132_s28, [#allocation6], %s801_s19, %s801_s19, %s802_s20  }
  0x2f   : > { %p1126_p4 = scmp.ne.s32.totalorder %s1120_s22, 0  ;;  %p1127_p0 = scmp.lt.s32.totalorder %s781_s15, 2 }
  0x30   : > { %s637_s8 = scalar_lea.hbm %s1113_s2, 384 }
  0x31   : > { %p929_p3 = pnand %p1127_p0, %p1126_p4  ;;  %p638_p5 = scmp.ne.s32.totalorder %s1113_s2, %s637_s8 }
  0x32   : > { %p644_p12 = scmp.lt.u32.totalorder %s637_s8, %s1113_s2 }
  0x33   : > { %s1128_s5 = scalar_select %p929_p3, 1, 0 }
  0x34   : > { %p640_p6 = pnand %p638_p5, %p611_p8 }
  0x36   : > { %p641_p11 = pneg %p640_p6 }
  0x38   : > { %p646_p13 = pnand %p644_p12, %p641_p11 }
  0x3a   : > { %649 = shalt.err (!%p646_p13)
}
  0x3b   : > { %s650_s11 = scalar_lea.vmem %s146_s4, 384  ;;  %p658_p1 = scmp.lt.s32.totalorder %s146_s4, %s146_s4 }
  0x3c   : > { %p651_p7 = scmp.ne.s32.totalorder %s146_s4, %s650_s11  ;;  %p659_p4 = scmp.lt.s32.totalorder %s650_s11, %s650_s11 }
  0x3e   : > { %p653_p9 = pnand %p651_p7, %p611_p8  ;;  %p660_p0 = por %p659_p4, %p658_p1 }
  0x40   : > { %p654_p10 = pneg %p653_p9 }
  0x42   : > { %p661_p3 = pnand %p660_p0, %p654_p10 }
  0x44   : > { %664 = shalt.err (!%p661_p3)
}
  0x45   : > { %525 = dma.hbm_to_vmem [thread:$0]  (!%p894_p2), %s1113_s2, 384, %s146_s4, [#allocation6]  }
  0x46   : > { %s156_s30 = sand.u32 1, %s777_s14   ;;  %s500_s7 = smul.u32 384, %s781_s15 }
  0x47   : > { %s504_s6 = smul.u32 864, %s156_s30  ;;  %s962_s22 = scalar_lea.sflag [#allocation3], %s156_s30 }
  0x48   : > { %s958_s10 = scalar_lea.hbm %s1111_s0, %s500_s7  ;;  %p1129_p8 = scmp.ne.s32.totalorder %s1128_s5, 0 }
  0x49   : > { %s160_s29 = scalar_lea.vmem [#allocation2], %s504_s6  ;;  %s665_s11 = scalar_lea.hbm %s958_s10, 13824 }
  0x4a   : > { %s167_s28 = sshll.u32 %s160_s29, 4  ;;  %p666_p2 = scmp.ne.s32.totalorder %s958_s10, %s665_s11  ;;  %s960_s28 = int_to_ptr.vmem [resolvable:$true] %s167_s28 }
  0x4b   : > { %p667_p3 = pneg %p1129_p8  ;;  %s670_s27 = scalar_lea.hbm %s1111_s0, 27648 }
  0x4c   : > { %p671_p11 = scmp.lt.u32.totalorder %s958_s10, %s1111_s0  ;;  %p672_p12 = scmp.lt.u32.totalorder %s670_s27, %s665_s11 }
  0x4d   : > { %p668_p5 = pnand %p667_p3, %p666_p2  ;;  %p674_p7 = scmp.lt.u32.totalorder %s665_s11, %s958_s10 }
  0x4e   : > { %p673_p13 = por %p672_p12, %p671_p11 }
  0x4f   : > { %p669_p6 = pneg %p668_p5 }
  0x50   : > { %p675_p9 = por %p674_p7, %p673_p13 }
  0x52   : > { %p676_p10 = pnand %p675_p9, %p669_p6 }
  0x54   : > { %679 = shalt.err (!%p676_p10)
}
  0x55   : > { %s680_s30 = scalar_lea.vmem %s960_s28, 13824  ;;  %s803_s6 = smov [#allocation2]  }
  0x56   : > { %p681_p1 = scmp.ne.s32.totalorder %s960_s28, %s680_s30  ;;  %s685_s9 = sshll.u32 %s803_s6, 4  ;;  %s686_s9 = int_to_ptr.vmem [resolvable:$false] %s685_s9 }
  0x57   : > { %s687_s29 = scalar_lea.vmem %s686_s9, 27648  ;;  %p688_p2 = scmp.lt.s32.totalorder %s960_s28, %s686_s9 }
  0x58   : > { %p683_p4 = pnand %p681_p1, %p667_p3  ;;  %p689_p5 = scmp.lt.s32.totalorder %s687_s29, %s680_s30 }
  0x5a   : > { %p684_p0 = pneg %p683_p4  ;;  %p690_p11 = por %p689_p5, %p688_p2 }
  0x5c   : > { %p691_p12 = pnand %p690_p11, %p684_p0 }
  0x5e   : > { %694 = shalt.err (!%p691_p12)
}
  0x5f   : > { %s804_s11 = smov 768   ;;  %p1130_p3 = scmp.ne.s32.totalorder %s1124_s26, 0 }
  0x60   : > { %529 = dma.hbm_to_vmem [thread:$0]  (!%p1129_p8), %s958_s10, 13824, %s960_s28, %s962_s22, %s804_s11, %s801_s19, %s802_s20  }
  0x61   : > { %179 = sbr.rel (%p1130_p3) target bundleno = 143 (0x8f), region = 32  ;;  %s995_s4 = sand.u32 (!%p1130_p3), 1, %s773_s13  }
  0x62   : > { %s505_s17 = smul.u32 (!%p1130_p3), 864, %s995_s4  ;;  %s182_s27 = scalar_lea.sflag (!%p1130_p3), [#allocation3], %s995_s4 }
  0x63   : > { %p1131_p6 = scmp.ne.s32.totalorder (!%p1130_p3), %s1121_s23, 0 }
  0x64   : > { %s999_s7 = scalar_lea.vmem (!%p1130_p3), [#allocation2], %s505_s17 }
  0x68   : > { %756 = dma.done.wait (%p1131_p6), %s182_s27, 13824  }
  0x69   : > { %758 = vsyncadd (%p1131_p6), %s182_s27, 4294953472  ;;  %p1132_p8 = scmp.eq.s32.totalorder %s847_s16, 0 }
  0x6b   : > { %760 = dma.done.wait (%p1132_p8), [#allocation6], 14208   ;;  %p1133_p13 = pmov %p1132_p8 }
  0x6c   : > { %s506_s26 = smul.u32 24, %s995_s4  ;;  %v218_v0 = vld [vmem:[#allocation7] sm:$0xff]   ;;  %v219_v1 = vld [vmem:[#allocation7 + $0x8] sm:$0xff]   ;;  %v220_v2 = vld [vmem:[#allocation7 + $0x10] sm:$0xff]   ;;  %s1018_s23 = smov 0  }
  0x6d   : > { %762 = vsyncadd (%p1133_p13), [#allocation6], 4294953088 }
  0x6e   : > { %s1010_s19 = scalar_lea.vmem [#allocation8], %s506_s26 }
  0x6f LB: >> { %s501_s20 = smul.u32 96, %s797_s23  ;;  %s226_s23 = sadd.s32 1, %s797_s23   ;;  %s797_s23 = sphi %s1018_s23, %s226_s23   ;;  %v793_v0 = vphi %v218_v0, %v1136_v0   ;;  %v789_v1 = vphi %v219_v1, %v1135_v1   ;;  %v785_v2 = vphi %v220_v2, %v1134_v2  }
  0x70   : >> { %p223_p7 = scmp.ge.s32.totalorder %s226_s23, 9  }
  0x71   : >> { %s1028_s5 = scalar_lea.vmem %s999_s7, %s501_s20 [#allocation2]  ;;  %s1030_s10 = scalar_lea.vmem [#allocation5], %s501_s20 }
  0x72   : >> { %v234_v3 = vld [vmem:[%s1030_s10] sm:$0xff]  ;;  %v235_v4 = vld [vmem:[%s1030_s10 + $0x8] sm:$0xff]  ;;  %v236_v5 = vld [vmem:[%s1030_s10 + $0x10] sm:$0xff]  ;;  %s503_s28 = smul.u32 (%p223_p7), 384, %s847_s16  ;;  %s323_s22 = sshll.u32 (%p223_p7), %s1010_s19, 4  ;;  %s324_s22 = int_to_ptr.vmem [resolvable:$true] %s323_s22 }
  0x73   : >> { %v239_v6 = vld [vmem:[%s1028_s5] sm:$0xff]  ;;  %v240_v7 = vld [vmem:[%s1028_s5 + $0x8] sm:$0xff]  ;;  %v241_v8 = vld [vmem:[%s1028_s5 + $0x10] sm:$0xff]  ;;  %s309_s9 = scalar_lea.sflag (%p223_p7), [#allocation4], %s995_s4  ;;  %s695_s29 = scalar_lea.vmem (%p223_p7), %s324_s22, 384 }
  0x74   : >> { %v242_v9 = vmul.f32 %v239_v6, %v234_v3  ;;  %v243_v10 = vmul.f32 %v240_v7, %v235_v4  ;;  %v244_v11 = vmul.f32 %v241_v8, %v236_v5  ;;  %v469_v12 = vld [vmem:[%s1030_s10 + $0x18] sm:$0xff]  ;;  %v470_v13 = vld [vmem:[%s1030_s10 + $0x20] sm:$0xff]  ;;  %v471_v14 = vld [vmem:[%s1030_s10 + $0x28] sm:$0xff]  ;;  %s1073_s6 = scalar_lea.hbm (%p223_p7), %s1114_s3, %s503_s28  ;;  %p696_p9 = scmp.ne.s32.totalorder (%p223_p7), %s324_s22, %s695_s29 }
  0x75   : >> { %v474_v15 = vld [vmem:[%s1028_s5 + $0x18] sm:$0xff]  ;;  %v475_v16 = vld [vmem:[%s1028_s5 + $0x20] sm:$0xff]  ;;  %v476_v17 = vld [vmem:[%s1028_s5 + $0x28] sm:$0xff]  ;;  %p1137_p10 = scmp.ne.s32.totalorder (%p223_p7), %s1122_s24, 0  ;;  %s805_s11 = smov (%p223_p7), [#allocation8]  }
  0x76   : >> { %v245_v18 = vadd.f32 %v793_v0, %v242_v9  ;;  %v246_v19 = vadd.f32 %v789_v1, %v243_v10  ;;  %v247_v20 = vadd.f32 %v785_v2, %v244_v11  ;;  %v260_v21 = vmul.f32 %v474_v15, %v469_v12  ;;  %v479_v22 = vld [vmem:[%s1030_s10 + $0x30] sm:$0xff]  ;;  %v480_v23 = vld [vmem:[%s1030_s10 + $0x38] sm:$0xff]  ;;  %v481_v24 = vld [vmem:[%s1030_s10 + $0x40] sm:$0xff]  ;;  %s699_s17 = sshll.u32 (%p223_p7), %s805_s11, 4  ;;  %s700_s17 = int_to_ptr.vmem [resolvable:$false] %s699_s17 }
  0x77   : >> { %v261_v25 = vmul.f32 %v475_v16, %v470_v13  ;;  %v262_v26 = vmul.f32 %v476_v17, %v471_v14  ;;  %v484_v27 = vld [vmem:[%s1028_s5 + $0x30] sm:$0xff]  ;;  %v485_v28 = vld [vmem:[%s1028_s5 + $0x38] sm:$0xff]  ;;  %v486_v29 = vld [vmem:[%s1028_s5 + $0x40] sm:$0xff]  ;;  %p697_p1 = pnand (%p223_p7), %p696_p9, %p1137_p10  ;;  %s701_s16 = scalar_lea.vmem (%p223_p7), %s700_s17, 768 }
  0x78   : >> { %v263_v30 = vadd.f32 %v260_v21, %v245_v18  ;;  %v278_v31 = vmul.f32 %v484_v27, %v479_v22  ;;  %v279_v32 = vmul.f32 %v485_v28, %v480_v23  ;;  %v280_v33 = vmul.f32 %v486_v29, %v481_v24  ;;  %v489_v34 = vld [vmem:[%s1030_s10 + $0x48] sm:$0xff]  ;;  %v490_v35 = vld [vmem:[%s1030_s10 + $0x50] sm:$0xff]  ;;  %v491_v36 = vld [vmem:[%s1030_s10 + $0x58] sm:$0xff]  ;;  %p702_p0 = scmp.lt.s32.totalorder (%p223_p7), %s324_s22, %s700_s17  ;;  %p703_p2 = scmp.lt.s32.totalorder (%p223_p7), %s701_s16, %s695_s29 }
  0x79   : >> { %v264_v37 = vadd.f32 %v261_v25, %v246_v19  ;;  %v265_v38 = vadd.f32 %v262_v26, %v247_v20  ;;  %v494_v39 = vld [vmem:[%s1028_s5 + $0x48] sm:$0xff]  ;;  %v495_v40 = vld [vmem:[%s1028_s5 + $0x50] sm:$0xff]  ;;  %v496_v41 = vld [vmem:[%s1028_s5 + $0x58] sm:$0xff]  ;;  %225 = sbr.rel (!%p223_p7) target bundleno = 111 (0x6f), region = 100  ;;  %p698_p4 = pneg (%p223_p7), %p697_p1 }
  0x7a   : >> { %v281_v42 = vadd.f32 %v278_v31, %v263_v30  ;;  %v296_v43 = vmul.f32 %v494_v39, %v489_v34  ;;  %v297_v44 = vmul.f32 %v495_v40, %v490_v35  ;;  %v298_v45 = vmul.f32 %v496_v41, %v491_v36  ;;  %p704_p5 = por (%p223_p7), %p703_p2, %p702_p0 }
  0x7b   : >> { %v282_v46 = vadd.f32 %v279_v32, %v264_v37  ;;  %v283_v47 = vadd.f32 %v280_v33, %v265_v38 }
  0x7c   : >> { %v299_v48 = vadd.f32 %v296_v43, %v281_v42   ;;  %p705_p11 = pnand (%p223_p7), %p704_p5, %p698_p4 }
  0x7d   : >> { %v300_v49 = vadd.f32 %v297_v44, %v282_v46   ;;  %v301_v50 = vadd.f32 %v298_v45, %v283_v47  }
  0x7e   : >> { %v1136_v0 = vmov %v299_v48  ;;  %v302_v51 = vmax.f32 (%p223_p7), %v299_v48, 0.0 }
  0x7f   : >> { %v1134_v2 = vmov %v301_v50  ;;  %v1135_v1 = vmov %v300_v49  ;;  %v303_v52 = vmax.f32 (%p223_p7), %v300_v49, 0.0  ;;  %v304_v53 = vmax.f32 (%p223_p7), %v301_v50, 0.0 }
  0x80   : > { %305 = vst [vmem:[%s1010_s19] sm:$0xff] %v302_v51 }
  0x81   : > { %306 = vst [vmem:[%s1010_s19 + $0x8] sm:$0xff] %v303_v52  ;;  %307 = vst [vmem:[%s1010_s19 + $0x10] sm:$0xff] %v304_v53 }
  0x82   : > { %708 = shalt.err (!%p705_p11)
}
  0x83   : > { %s709_s4 = scalar_lea.hbm %s1073_s6, 384  ;;  %s713_s26 = scalar_lea.hbm %s1114_s3, 768 }
  0x84   : > { %p710_p12 = scmp.ne.s32.totalorder %s1073_s6, %s709_s4  ;;  %p714_p8 = scmp.lt.u32.totalorder %s1073_s6, %s1114_s3 }
  0x85   : > { %p715_p13 = scmp.lt.u32.totalorder %s713_s26, %s709_s4  ;;  %p717_p9 = scmp.lt.u32.totalorder %s709_s4, %s1073_s6 }
  0x86   : > { %p711_p3 = pnand %p710_p12, %p1137_p10 }
  0x87   : > { %p716_p7 = por %p715_p13, %p714_p8 }
  0x88   : > { %p712_p6 = pneg %p711_p3 }
  0x89   : > { %p718_p1 = por %p717_p9, %p716_p7 }
  0x8b   : > { %p719_p4 = pnand %p718_p1, %p712_p6 }
  0x8d   : > { %722 = shalt.err (!%p719_p4)
}
  0x8e   : > { %517 = dma.vmem_to_hbm [thread:$0]  (%p1137_p10), %s324_s22, 384, %s1073_s6, %s309_s9  }
  0x8f PF: > { %s335_s20 = sand.u32 1, %s769_s12   ;;  %p1138_p0 = scmp.ne.s32.totalorder %s1123_s25, 0 }
  0x90   : > { %p1139_p2 = scmp.ge.s32.totalorder %s781_s15, 2  ;;  %s336_s5 = scalar_lea.sflag [#allocation4], %s335_s20 }
  0x92   : > { %p531_p5 = pnand %p1139_p2, %p1138_p0 }
  0x94   : > { %764 = dma.done.wait (!%p531_p5), %s336_s5, 384  }
  0x95   : > { %766 = vsyncadd (!%p531_p5), %s336_s5, 4294966912  ;;  %p17_p11 = scmp.ge.s32.totalorder %s851_s18, 4   ;;  %s1140_s12 = smov %s773_s13 }
  0x96   : > { %s1141_s13 = smov %s777_s14  ;;  %s1142_s14 = smov %s863_s21 }
  0x97   : > { %s1143_s15 = smov %s851_s18  ;;  %19 = sbr.rel (!%p17_p11) target bundleno = 6 (0x6), region = 111 }
  0x9e   :  { %341 = vsyncpa [#allocation3], 1 }
  0x9f   :  { %343 = vsyncpa [#allocation3 + $0x1], 1 }
  0xa0   :  { %344 = vsyncpa [#allocation6], 1 }
  0xa1   :  { %345 = vsyncpa [#allocation4], 1 }
  0xa2   :  { %347 = vsyncpa [#allocation4 + $0x1], 1 }

</bundles_post_ra>
